<compile_context>
chip_gen: v5e
topology: v5e:2x2
jax: 0.10.0
libtpu: 0.0.40
codegen_flags: <defaults>
</compile_context>

<pallas_src>
import jax
import jax.numpy as jnp
from jax.experimental import pallas as pl
from jax.experimental.pallas import tpu as pltpu


# ---------------------------------------------------------------------------
# Primary path: zero-copy identity via input/output aliasing.
# ---------------------------------------------------------------------------
def _alias_noop_kernel(x_hbm_ref, o_hbm_ref):
    # The output HBM buffer is aliased to the input HBM buffer, so the data
    # is already in place: nothing to compute, nothing to DMA.
    del x_hbm_ref, o_hbm_ref


def identity_pallas_aliased(x: jax.Array) -> jax.Array:
    """Identity with the output aliased onto the input buffer (no HBM traffic)."""
    return pl.pallas_call(
        _alias_noop_kernel,
        out_shape=jax.ShapeDtypeStruct(x.shape, x.dtype),
        in_specs=[pl.BlockSpec(memory_space=pl.ANY)],
        out_specs=pl.BlockSpec(memory_space=pl.ANY),
        input_output_aliases={0: 0},
        compiler_params=pltpu.CompilerParams(has_side_effects=True),
    )(x)


# ---------------------------------------------------------------------------
# Explicit-copy path (fallback): lane-dense, byte-budgeted tiled VMEM copy.
# ---------------------------------------------------------------------------
def _copy_kernel(x_ref, o_ref):
    # Element-wise passthrough of the current VMEM tile.
    o_ref[...] = x_ref[...]


def _lane_dense_2d(x: jax.Array) -> jax.Array:
    """Reshape to (rows, cols) with lane-dense cols (multiple of 128) if possible."""
    if x.ndim == 0:
        return x.reshape(1, 1)
    numel = x.size
    # Largest multiple of 128 in [128, 4096] that divides the element count.
    for cols in range(4096, 127, -128):
        if numel % cols == 0:
            return x.reshape(-1, cols)
    # Fallback: natural last dim as the lane axis.
    if x.ndim == 1:
        return x.reshape(1, -1)
    return x.reshape(-1, x.shape[-1])


def identity_pallas_copy(x: jax.Array) -> jax.Array:
    """Identity as an explicit HBM->VMEM->HBM tiled copy."""
    orig_shape = x.shape
    x2d = _lane_dense_2d(x)
    rows, cols = x2d.shape
    itemsize = jnp.dtype(x2d.dtype).itemsize

    # Sublane packing granularity: f32 -> 8 rows, bf16 -> 16, int8/fp8 -> 32.
    sublane = max(8, 32 // itemsize)

    # Byte-budgeted tiles (~4 MiB per buffer). With double-buffered input and
    # output that is ~16 MiB live, within the 32 MiB scoped-VMEM limit below.
    budget_bytes = 4 * 1024 * 1024
    row_bytes = max(1, cols * itemsize)
    tile_rows = max(1, budget_bytes // row_bytes)
    if tile_rows >= rows:
        tile_rows = rows  # full extent: always a legal block shape
    else:
        tile_rows = max(sublane, (tile_rows // sublane) * sublane)

    grid = (pl.cdiv(rows, tile_rows),)

    out2d = pl.pallas_call(
        _copy_kernel,
        out_shape=jax.ShapeDtypeStruct((rows, cols), x2d.dtype),
        grid_spec=pltpu.PrefetchScalarGridSpec(
            num_scalar_prefetch=0,
            grid=grid,
            in_specs=[pl.BlockSpec((tile_rows, cols), lambda i: (i, 0))],
            out_specs=pl.BlockSpec((tile_rows, cols), lambda i: (i, 0)),
        ),
        compiler_params=pltpu.CompilerParams(
            dimension_semantics=("parallel",),
            vmem_limit_bytes=32 * 1024 * 1024,
        ),
    )(x2d)

    return out2d.reshape(orig_shape)


# ---------------------------------------------------------------------------
# Module-level wrappers (parity with the PyTorch IdentityModel).
# ---------------------------------------------------------------------------
def identity_pallas(x: jax.Array) -> jax.Array:
    """Identity forward pass. Prefers the zero-copy aliased kernel."""
    try:
        return identity_pallas_aliased(x)
    except Exception:
        # Robustness fallback: explicit tiled copy (always supported).
        return identity_pallas_copy(x)


def init_identity_model_params(key: jax.Array):
    """Deterministic params for the unused nn.Linear(1, 1) (never used in forward)."""
    k_w, k_b = jax.random.split(key)
    # Match PyTorch Linear(1, 1): weight (1, 1), bias (1,), uniform(-1, 1) bound.
    weight = jax.random.uniform(k_w, (1, 1), jnp.float32, -1.0, 1.0)
    bias = jax.random.uniform(k_b, (1,), jnp.float32, -1.0, 1.0)
    return {"unused": {"weight": weight, "bias": bias}}


def identity_model_forward(params, x):
    # Forward ignores params entirely, exactly like the PyTorch module.
    del params
    return identity_pallas(x)


if __name__ == "__main__":
    key = jax.random.PRNGKey(0)
    k_params, k_x = jax.random.split(key)

    params = init_identity_model_params(k_params)

    # Small NCHW-shaped input, consistent with a generic benchmark input.
    x = jax.random.normal(k_x, (2, 4, 16, 16), dtype=jnp.float32)

    y = jax.block_until_ready(identity_model_forward(params, x))
    assert y.shape == x.shape and y.dtype == x.dtype
    assert bool(jnp.all(y == x))

    # Also exercise the explicit-copy fallback path.
    y2 = jax.block_until_ready(identity_pallas_copy(x))
    assert y2.shape == x.shape and y2.dtype == x.dtype
    assert bool(jnp.all(y2 == x))

    print("KERNEL_OK")
</pallas_src>

<mosaic_0001>
module attributes {stable_mosaic.version = 11 : i64} {
  func.func @_alias_noop_kernel(%arg0: memref<2x4x16x16xf32, #tpu.memory_space<any>>, %arg1: memref<2x4x16x16xf32, #tpu.memory_space<any>>) attributes {dimension_semantics = [], scalar_prefetch = 0 : i64, scratch_operands = 0 : i64, tpu.core_type = #tpu.core_type<tc>} {
    return
  }
}

module attributes {stable_mosaic.version = 11 : i64} {
  func.func @_copy_kernel(%arg0: i32, %arg1: memref<1x2048xf32, #tpu.memory_space<vmem>>, %arg2: memref<1x2048xf32, #tpu.memory_space<vmem>>) attributes {dimension_semantics = [#tpu.dimension_semantics<parallel>], iteration_bounds = array<i64: 1>, scalar_prefetch = 0 : i64, scratch_operands = 0 : i64, tpu.core_type = #tpu.core_type<tc>, window_params = [{transform_indices = @transform_0, window_bounds = array<i64: 1, 2048>}, {transform_indices = @transform_1, window_bounds = array<i64: 1, 2048>}]} {
    %c0 = arith.constant 0 : index
    %c0_0 = arith.constant 0 : index
    %0 = vector.load %arg1[%c0, %c0_0] : memref<1x2048xf32, #tpu.memory_space<vmem>>, vector<1x2048xf32>
    %c0_1 = arith.constant 0 : index
    %c0_2 = arith.constant 0 : index
    %1 = vector.load %arg2[%c0_1, %c0_2] : memref<1x2048xf32, #tpu.memory_space<vmem>>, vector<1x2048xf32>
    tpu.vector_store %arg2[%c0_1, %c0_2], %0 {strides = array<i32>} : memref<1x2048xf32, #tpu.memory_space<vmem>>, vector<1x2048xf32>,
    return
  }
  func.func @transform_0(%arg0: i32) -> (i32, i32) {
    %c0_i32 = arith.constant 0 : i32
    %c0_i32_0 = arith.constant 0 : i32
    return %arg0, %c0_i32 : i32, i32
  }
  func.func @transform_1(%arg0: i32) -> (i32, i32) {
    %c0_i32 = arith.constant 0 : i32
    %c0_i32_0 = arith.constant 0 : i32
    return %arg0, %c0_i32 : i32, i32
  }
}

</mosaic_0001>

<bundles_post_ra>
// kernel: tpu_custom_call.1
= control target key start
LH: loop header
LB: loop body
LE: loop exit
PB: predicated region body
PF: predicated region fallthrough
CT: control target
= control target key end

     0   :  { %s16_s0 = inlined_call_operand.hbm [shape: f32[2,4,16,16], index: 0, kind: input, shape index: {}, may-alias: {0,1}]   ;;  %s17_s1 = inlined_call_operand.hbm [shape: f32[2,4,16,16], index: 1, kind: output, shape index: {}, may-alias: {0,1}]  }

// kernel: tpu_custom_call.1
= control target key start
LH: loop header
LB: loop body
LE: loop exit
PB: predicated region body
PF: predicated region fallthrough
CT: control target
= control target key end

     0   :  { %6 = vsyncpa [#allocation3], 0  ;;  %s116_s0 = inlined_call_operand.hbm [shape: f32[1,2048], index: 0, kind: input, shape index: {}]   ;;  %s117_s1 = inlined_call_operand.hbm [shape: f32[1,2048], index: 1, kind: output, shape index: {}]  }
   0x1   :  { %7 = vsyncpa [#allocation4], 0  ;;  %s13_s8 = sshll.u32 %s116_s0, 4  ;;  %s98_s9 = smov [#allocation2]   ;;  %s14_s8 = int_to_ptr.hbm [resolvable:$true] %s13_s8 }
   0x2   :  { %s15_s10 = sshll.u32 %s98_s9, 4  ;;  %s16_s10 = int_to_ptr.vmem [resolvable:$true] %s15_s10 }
   0x3   :  { %18 = dma.hbm_to_vmem [thread:$0]  %s14_s8, 256, %s16_s10, [#allocation3]  }
   0x4   :  { %94 = dma.done.wait [#allocation3], 256  }
   0x5   :  { %95 = vsyncadd [#allocation3], 4294967040  ;;  %s99_s11 = smov [#allocation5]   ;;  %s34_s15 = sshll.u32 %s117_s1, 4  ;;  %v23_v0 = vld [vmem:[#allocation2] sm:$0xff]  ;;  %v24_v1 = vld [vmem:[#allocation2 + $0x8] sm:$0xff]  ;;  %s35_s15 = int_to_ptr.hbm [resolvable:$true] %s34_s15 }
   0x6   :  { %s32_s12 = sshll.u32 %s99_s11, 4  ;;  %25 = vst [vmem:[#allocation5] sm:$0xff] %v23_v0  ;;  %s33_s12 = int_to_ptr.vmem [resolvable:$true] %s32_s12 }
   0x7   :  { %26 = vst [vmem:[#allocation5 + $0x8] sm:$0xff] %v24_v1 }
   0x8   :  { %37 = dma.vmem_to_hbm [thread:$0]  %s33_s12, 256, %s35_s15, [#allocation4]  }
   0x9   :  { %96 = dma.done.wait [#allocation4], 256  }
   0xa   :  { %97 = vsyncadd [#allocation4], 4294967040 }
   0xb   :  { %42 = vsyncpa [#allocation3], 1 }
   0xc   :  { %43 = vsyncpa [#allocation4], 1 }

</bundles_post_ra>
